<compile_context>
chip_gen: v6e
topology: v6e:2x2x1
jax: 0.10.0
libtpu: 0.0.40
codegen_flags: <defaults>
</compile_context>

<pallas_src>
import functools
import math

import jax
import jax.numpy as jnp
from jax.experimental import pallas as pl
from jax.experimental.pallas import tpu as pltpu


CFG = dict(
    vocab_size=100,
    type_vocab_size=2,
    max_position=64,
    hidden=32,
    heads=2,
    layers=2,
    intermediate=64,
    num_labels=2,
)

LANE = 128      # lane-dense padded width for the classifier output
LN_EPS = 1e-12  # BERT LayerNorm eps


# ------------------------------ fused kernel --------------------------------

def _bert_kernel(emb_ref, mask_ref, emb_g_ref, emb_b_ref,
                 wqkv_ref, bqkv_ref, wo_ref, bo_ref, ln1g_ref, ln1b_ref,
                 wi_ref, bi_ref, wf_ref, bf_ref, ln2g_ref, ln2b_ref,
                 poolw_ref, poolb_ref, clsw_ref, clsb_ref,
                 out_ref, h_ref, *, TB, S, H, nH):
    """One (batch-tile, layer) grid step of the BERT encoder.

    grid = (B // TB, L):
      axis 0 ("parallel")  -> batch tiles (shardable across TensorCores on v7x)
      axis 1 ("arbitrary") -> encoder layers; per-layer weights streamed per step
    The hidden state is carried across the layer axis in the VMEM scratch h_ref.
    """
    Dh = H // nH
    scale = 1.0 / math.sqrt(Dh)
    bf16 = jnp.bfloat16

    def mm(x, w):
        # bf16 MXU matmul with f32 accumulation.
        return jnp.dot(x.astype(bf16), w.astype(bf16),
                       preferred_element_type=jnp.float32)

    def layer_norm(x, g, b):
        # f32 statistics (v5e has no bf16 VPU/EUP); biased variance = torch LayerNorm.
        mean = jnp.mean(x, axis=-1, keepdims=True)
        xc = x - mean
        var = jnp.mean(xc * xc, axis=-1, keepdims=True)
        return xc * jax.lax.rsqrt(var + LN_EPS) * g + b

    l = pl.program_id(1)

    # ---- first layer of this batch tile: embedding LayerNorm into carried scratch ----
    @pl.when(l == 0)
    def _():
        h_ref[...] = layer_norm(emb_ref[...], emb_g_ref[...], emb_b_ref[...])

    h = h_ref[...]                                         # (TB*S, H) f32

    # ---- fused QKV projection: one MXU pass over 3H output lanes ----
    qkv = mm(h, wqkv_ref[...]) + bqkv_ref[...]             # (TB*S, 3H) f32

    # Gather per-head lanes into a (TB*nH, S, Dh) leading-axis batch.  Only static
    # lane slices + leading-axis stacks/reshapes (no lane-splitting reshapes); the
    # 1/sqrt(Dh) scale is folded into q.
    def gather_heads(base, fold_scale=False):
        cols = [qkv[:, base + hh * Dh: base + (hh + 1) * Dh].reshape(TB, S, Dh)
                for hh in range(nH)]
        x = jnp.stack(cols, axis=1).reshape(TB * nH, S, Dh)
        if fold_scale:
            x = x * scale
        return x.astype(bf16)

    q = gather_heads(0, fold_scale=True)                   # (TB*nH, S, Dh) bf16
    k = gather_heads(H)
    v = gather_heads(2 * H)

    # scores for ALL heads in one batched contraction (no per-head MXU pushes)
    s = jnp.einsum('bqd,bkd->bqk', q, k,
                   preferred_element_type=jnp.float32)     # (TB*nH, S, S) f32
    s = s.reshape(TB, nH, S, S) + mask_ref[...][:, :, None, :]   # additive key mask

    # softmax in f32, reciprocal on the EUP
    s = s - jnp.max(s, axis=-1, keepdims=True)
    p = jnp.exp(s)
    p = p * pl.reciprocal(jnp.sum(p, axis=-1, keepdims=True), approx=True)

    ctx = jnp.einsum('bqk,bkd->bqd',
                     p.reshape(TB * nH, S, S).astype(bf16), v,
                     preferred_element_type=jnp.float32)   # (TB*nH, S, Dh) f32
    ctx = ctx.reshape(TB, nH, S, Dh)
    ctx = jnp.concatenate(
        [ctx[:, hh, :, :].reshape(TB * S, Dh) for hh in range(nH)], axis=-1)  # (TB*S, H)

    # ---- attention output projection + residual + LN ----
    h = layer_norm(h + mm(ctx, wo_ref[...]) + bo_ref[...],
                   ln1g_ref[...], ln1b_ref[...])

    # ---- FFN: dense -> GELU -> dense, residual + LN ----
    inter = mm(h, wi_ref[...]) + bi_ref[...]               # (TB*S, I) f32
    # TODO(synk): tanh-approx GELU; PyTorch BertModel uses exact erf GELU.
    c = math.sqrt(2.0 / math.pi)
    inter = 0.5 * inter * (1.0 + jnp.tanh(c * (inter + 0.044715 * inter * inter * inter)))
    h = layer_norm(h + mm(inter, wf_ref[...]) + bf_ref[...],
                   ln2g_ref[...], ln2b_ref[...])

    h_ref[...] = h                                         # carry to the next layer

    # ---- last layer: pooler (tanh on [CLS]) + classifier epilogue ----
    @pl.when(l == pl.num_programs(1) - 1)
    def _():
        cls = h.reshape(TB, S, H)[:, 0, :]                 # static CLS-row slice (TB, H)
        pooled = jnp.tanh(mm(cls, poolw_ref[...]) + poolb_ref[...])
        logits = mm(pooled, clsw_ref[...]) + clsb_ref[...]  # (TB, LANE) lane-dense
        out_ref[...] = logits[:, None, :].astype(out_ref.dtype)


# ------------------------------ params / glue --------------------------------

def init_params(key, cfg):
    std = 0.02
    H, I, L = cfg["hidden"], cfg["intermediate"], cfg["layers"]
    NL = cfg["num_labels"]
    bf16 = jnp.bfloat16
    keys = jax.random.split(key, 16)

    def nrm(k, shape):
        return jax.random.normal(k, shape, dtype=jnp.float32) * std

    # lane-dense (128-wide) padded classifier built ONCE at init (not per forward call)
    cls_w = nrm(keys[8], (H, NL))
    cls_b = jnp.zeros((1, NL), jnp.float32)
    cls_w_pad = jnp.zeros((H, LANE), jnp.float32).at[:, :NL].set(cls_w)
    cls_b_pad = jnp.zeros((1, LANE), jnp.float32).at[:, :NL].set(cls_b)

    return dict(
        word_emb=nrm(keys[0], (cfg["vocab_size"], H)),
        pos_emb=nrm(keys[1], (cfg["max_position"], H)),
        type_emb=nrm(keys[2], (cfg["type_vocab_size"], H)),
        emb_ln_g=jnp.ones((1, H), jnp.float32),
        emb_ln_b=jnp.zeros((1, H), jnp.float32),
        # per-layer weights stacked on a leading L axis (streamed by BlockSpec);
        # matmul weights stored in bf16, biases / LayerNorm params in f32
        wqkv=nrm(keys[3], (L, H, 3 * H)).astype(bf16),
        bqkv=jnp.zeros((L, 1, 3 * H), jnp.float32),
        wo=nrm(keys[4], (L, H, H)).astype(bf16),
        bo=jnp.zeros((L, 1, H), jnp.float32),
        ln1_g=jnp.ones((L, 1, H), jnp.float32),
        ln1_b=jnp.zeros((L, 1, H), jnp.float32),
        wi=nrm(keys[5], (L, H, I)).astype(bf16),
        bi=jnp.zeros((L, 1, I), jnp.float32),
        wf=nrm(keys[6], (L, I, H)).astype(bf16),
        bf=jnp.zeros((L, 1, H), jnp.float32),
        ln2_g=jnp.ones((L, 1, H), jnp.float32),
        ln2_b=jnp.zeros((L, 1, H), jnp.float32),
        pool_w=nrm(keys[7], (H, H)).astype(bf16),
        pool_b=jnp.zeros((1, H), jnp.float32),
        cls_w_pad=cls_w_pad.astype(bf16),
        cls_b_pad=cls_b_pad,
    )


def forward(params, input_ids, attention_mask, token_type_ids, cfg, batch_tile=1):
    B, S = input_ids.shape
    H, nH, L, I = cfg["hidden"], cfg["heads"], cfg["layers"], cfg["intermediate"]
    NL = cfg["num_labels"]
    TB = batch_tile
    assert H % nH == 0 and B % TB == 0 and (TB * S) % 8 == 0

    # ---- embeddings (gather = XLA glue; everything else runs in the kernel) ----
    emb = (jnp.take(params["word_emb"], input_ids, axis=0)
           + params["pos_emb"][None, :S, :]
           + jnp.take(params["type_emb"], token_type_ids, axis=0)).reshape(B * S, H)

    # additive key mask (B, 1, S); broadcast to heads/queries inside the kernel
    addmask = ((1.0 - attention_mask.astype(jnp.float32)) * -1e9).reshape(B, 1, S)

    grid = (B // TB, L)
    lsel = lambda b, l: (l, 0, 0)     # stacked (L, ...) per-layer weight blocks
    bsel2 = lambda b, l: (b, 0)       # per-batch-tile 2-D blocks
    bsel3 = lambda b, l: (b, 0, 0)    # per-batch-tile 3-D blocks
    const2 = lambda b, l: (0, 0)      # whole-array blocks

    in_specs = [
        pl.BlockSpec((TB * S, H), bsel2),        # emb
        pl.BlockSpec((TB, 1, S), bsel3),         # additive mask
        pl.BlockSpec((1, H), const2),            # emb LN gamma
        pl.BlockSpec((1, H), const2),            # emb LN beta
        pl.BlockSpec((None, H, 3 * H), lsel),    # wqkv  (layer-streamed)
        pl.BlockSpec((None, 1, 3 * H), lsel),    # bqkv
        pl.BlockSpec((None, H, H), lsel),        # wo
        pl.BlockSpec((None, 1, H), lsel),        # bo
        pl.BlockSpec((None, 1, H), lsel),        # ln1 gamma
        pl.BlockSpec((None, 1, H), lsel),        # ln1 beta
        pl.BlockSpec((None, H, I), lsel),        # wi
        pl.BlockSpec((None, 1, I), lsel),        # bi
        pl.BlockSpec((None, I, H), lsel),        # wf
        pl.BlockSpec((None, 1, H), lsel),        # bf
        pl.BlockSpec((None, 1, H), lsel),        # ln2 gamma
        pl.BlockSpec((None, 1, H), lsel),        # ln2 beta
        pl.BlockSpec((H, H), const2),            # pooler W
        pl.BlockSpec((1, H), const2),            # pooler b
        pl.BlockSpec((H, LANE), const2),         # classifier W (lane-padded)
        pl.BlockSpec((1, LANE), const2),         # classifier b (lane-padded)
    ]
    out_spec = pl.BlockSpec((TB, 1, LANE), bsel3)

    logits_pad = pl.pallas_call(
        functools.partial(_bert_kernel, TB=TB, S=S, H=H, nH=nH),
        out_shape=jax.ShapeDtypeStruct((B, 1, LANE), jnp.float32),
        grid_spec=pltpu.PrefetchScalarGridSpec(
            num_scalar_prefetch=0,
            grid=grid,
            in_specs=in_specs,
            out_specs=out_spec,
            scratch_shapes=[pltpu.VMEM((TB * S, H), jnp.float32)],   # carried hidden state
        ),
        compiler_params=pltpu.CompilerParams(
            dimension_semantics=("parallel", "arbitrary"),
            vmem_limit_bytes=32 * 1024 * 1024,
        ),
    )(
        emb, addmask,
        params["emb_ln_g"], params["emb_ln_b"],
        params["wqkv"], params["bqkv"], params["wo"], params["bo"],
        params["ln1_g"], params["ln1_b"],
        params["wi"], params["bi"], params["wf"], params["bf"],
        params["ln2_g"], params["ln2_b"],
        params["pool_w"], params["pool_b"],
        params["cls_w_pad"], params["cls_b_pad"],
    )
    return logits_pad[:, 0, :NL]


# --------------------------------- driver -----------------------------------

if __name__ == "__main__":
    cfg = CFG
    B, S = 2, 8

    key = jax.random.PRNGKey(0)
    k_param, k_ids = jax.random.split(key)
    params = init_params(k_param, cfg)

    input_ids = jax.random.randint(k_ids, (B, S), 0, cfg["vocab_size"], dtype=jnp.int32)
    # sentence-pair: first half sentence A (type 0), second half sentence B (type 1)
    token_type_ids = jnp.concatenate(
        [jnp.zeros((B, S // 2), jnp.int32), jnp.ones((B, S // 2), jnp.int32)], axis=1)
    # mask out the last token of the second example to exercise the attention mask
    attention_mask = jnp.ones((B, S), jnp.int32).at[1, S - 1].set(0)

    fwd = jax.jit(functools.partial(forward, cfg=cfg))
    logits = fwd(params, input_ids, attention_mask, token_type_ids)
    jax.block_until_ready(logits)

    assert logits.shape == (B, cfg["num_labels"])
    assert bool(jnp.all(jnp.isfinite(logits)))
    print("KERNEL_OK")
</pallas_src>

<mosaic_0001>
module attributes {stable_mosaic.version = 11 : i64} {
  func.func @_bert_kernel(%arg0: i32, %arg1: i32, %arg2: memref<8x32xf32, #tpu.memory_space<vmem>>, %arg3: memref<1x1x8xf32, #tpu.memory_space<vmem>>, %arg4: memref<1x32xf32, #tpu.memory_space<vmem>>, %arg5: memref<1x32xf32, #tpu.memory_space<vmem>>, %arg6: memref<1x32x96xbf16, #tpu.memory_space<vmem>>, %arg7: memref<1x1x96xf32, #tpu.memory_space<vmem>>, %arg8: memref<1x32x32xbf16, #tpu.memory_space<vmem>>, %arg9: memref<1x1x32xf32, #tpu.memory_space<vmem>>, %arg10: memref<1x1x32xf32, #tpu.memory_space<vmem>>, %arg11: memref<1x1x32xf32, #tpu.memory_space<vmem>>, %arg12: memref<1x32x64xbf16, #tpu.memory_space<vmem>>, %arg13: memref<1x1x64xf32, #tpu.memory_space<vmem>>, %arg14: memref<1x64x32xbf16, #tpu.memory_space<vmem>>, %arg15: memref<1x1x32xf32, #tpu.memory_space<vmem>>, %arg16: memref<1x1x32xf32, #tpu.memory_space<vmem>>, %arg17: memref<1x1x32xf32, #tpu.memory_space<vmem>>, %arg18: memref<32x32xbf16, #tpu.memory_space<vmem>>, %arg19: memref<1x32xf32, #tpu.memory_space<vmem>>, %arg20: memref<32x128xbf16, #tpu.memory_space<vmem>>, %arg21: memref<1x128xf32, #tpu.memory_space<vmem>>, %arg22: memref<1x1x128xf32, #tpu.memory_space<vmem>>, %arg23: memref<8x32xf32, #tpu.memory_space<vmem>>) attributes {dimension_semantics = [#tpu.dimension_semantics<parallel>, #tpu.dimension_semantics<arbitrary>], iteration_bounds = array<i64: 2, 2>, scalar_prefetch = 0 : i64, scratch_operands = 1 : i64, tpu.core_type = #tpu.core_type<tc>, window_params = [{transform_indices = @transform_0, window_bounds = array<i64: 8, 32>}, {transform_indices = @transform_1, window_bounds = array<i64: 1, 1, 8>}, {pipeline_mode = #tpu.pipeline_mode<synchronous>, transform_indices = @transform_2, window_bounds = array<i64: 1, 32>}, {pipeline_mode = #tpu.pipeline_mode<synchronous>, transform_indices = @transform_3, window_bounds = array<i64: 1, 32>}, {transform_indices = @transform_4, window_bounds = array<i64: 1, 32, 96>}, {transform_indices = @transform_5, window_bounds = array<i64: 1, 1, 96>}, {transform_indices = @transform_6, window_bounds = array<i64: 1, 32, 32>}, {transform_indices = @transform_7, window_bounds = array<i64: 1, 1, 32>}, {transform_indices = @transform_8, window_bounds = array<i64: 1, 1, 32>}, {transform_indices = @transform_9, window_bounds = array<i64: 1, 1, 32>}, {transform_indices = @transform_10, window_bounds = array<i64: 1, 32, 64>}, {transform_indices = @transform_11, window_bounds = array<i64: 1, 1, 64>}, {transform_indices = @transform_12, window_bounds = array<i64: 1, 64, 32>}, {transform_indices = @transform_13, window_bounds = array<i64: 1, 1, 32>}, {transform_indices = @transform_14, window_bounds = array<i64: 1, 1, 32>}, {transform_indices = @transform_15, window_bounds = array<i64: 1, 1, 32>}, {pipeline_mode = #tpu.pipeline_mode<synchronous>, transform_indices = @transform_16, window_bounds = array<i64: 32, 32>}, {pipeline_mode = #tpu.pipeline_mode<synchronous>, transform_indices = @transform_17, window_bounds = array<i64: 1, 32>}, {pipeline_mode = #tpu.pipeline_mode<synchronous>, transform_indices = @transform_18, window_bounds = array<i64: 32, 128>}, {pipeline_mode = #tpu.pipeline_mode<synchronous>, transform_indices = @transform_19, window_bounds = array<i64: 1, 128>}, {transform_indices = @transform_20, window_bounds = array<i64: 1, 1, 128>}]} {
    %c0_i32 = arith.constant 0 : i32
    %0 = arith.cmpi eq, %arg1, %c0_i32 : i32
    %1 = arith.extui %0 : i1 to i32
    %c0_i32_0 = arith.constant 0 : i32
    %2 = arith.cmpi ne, %1, %c0_i32_0 : i32
    scf.if %2 {
      %c0_66 = arith.constant 0 : index
      %c0_67 = arith.constant 0 : index
      %159 = vector.load %arg2[%c0_66, %c0_67] : memref<8x32xf32, #tpu.memory_space<vmem>>, vector<8x32xf32>
      %c0_68 = arith.constant 0 : index
      %c0_69 = arith.constant 0 : index
      %160 = vector.load %arg4[%c0_68, %c0_69] : memref<1x32xf32, #tpu.memory_space<vmem>>, vector<1x32xf32>
      %c0_70 = arith.constant 0 : index
      %c0_71 = arith.constant 0 : index
      %161 = vector.load %arg5[%c0_70, %c0_71] : memref<1x32xf32, #tpu.memory_space<vmem>>, vector<1x32xf32>
      %cst_72 = arith.constant dense<0.000000e+00> : vector<8xf32>
      %162 = vector.multi_reduction <add>, %159, %cst_72 [1] : vector<8x32xf32> to vector<8xf32>
      %163 = vector.shape_cast %162 : vector<8xf32> to vector<8x1xf32>
      %cst_73 = arith.constant 3.200000e+01 : f32
      %164 = vector.broadcast %cst_73 : f32 to vector<8x1xf32>
      %165 = arith.divf %163, %164 : vector<8x1xf32>
      %166 = vector.broadcast %165 : vector<8x1xf32> to vector<8x32xf32>
      %167 = arith.subf %159, %166 : vector<8x32xf32>
      %168 = arith.mulf %167, %167 : vector<8x32xf32>
      %cst_74 = arith.constant dense<0.000000e+00> : vector<8xf32>
      %169 = vector.multi_reduction <add>, %168, %cst_74 [1] : vector<8x32xf32> to vector<8xf32>
      %170 = vector.shape_cast %169 : vector<8xf32> to vector<8x1xf32>
      %cst_75 = arith.constant 3.200000e+01 : f32
      %171 = vector.broadcast %cst_75 : f32 to vector<8x1xf32>
      %172 = arith.divf %170, %171 : vector<8x1xf32>
      %cst_76 = arith.constant 9.99999996E-13 : f32
      %173 = vector.broadcast %cst_76 : f32 to vector<8x1xf32>
      %174 = arith.addf %172, %173 : vector<8x1xf32>
      %175 = math.rsqrt %174 : vector<8x1xf32>
      %176 = vector.broadcast %175 : vector<8x1xf32> to vector<8x32xf32>
      %177 = arith.mulf %167, %176 : vector<8x32xf32>
      %178 = vector.broadcast %160 : vector<1x32xf32> to vector<8x32xf32>
      %179 = arith.mulf %177, %178 : vector<8x32xf32>
      %180 = vector.broadcast %161 : vector<1x32xf32> to vector<8x32xf32>
      %181 = arith.addf %179, %180 : vector<8x32xf32>
      %c0_77 = arith.constant 0 : index
      %c0_78 = arith.constant 0 : index
      %182 = vector.load %arg23[%c0_77, %c0_78] : memref<8x32xf32, #tpu.memory_space<vmem>>, vector<8x32xf32>
      tpu.vector_store %arg23[%c0_77, %c0_78], %181 {strides = array<i32>} : memref<8x32xf32, #tpu.memory_space<vmem>>, vector<8x32xf32>,
    } else {
    }
    %c0 = arith.constant 0 : index
    %c0_1 = arith.constant 0 : index
    %3 = vector.load %arg23[%c0, %c0_1] : memref<8x32xf32, #tpu.memory_space<vmem>>, vector<8x32xf32>
    %c0_2 = arith.constant 0 : index
    %c0_3 = arith.constant 0 : index
    %c0_4 = arith.constant 0 : index
    %4 = vector.load %arg6[%c0_2, %c0_3, %c0_4] : memref<1x32x96xbf16, #tpu.memory_space<vmem>>, vector<1x32x96xbf16>
    %5 = vector.shape_cast %4 : vector<1x32x96xbf16> to vector<32x96xbf16>
    %6 = arith.truncf %3 : vector<8x32xf32> to vector<8x32xbf16>
    %cst = arith.constant dense<0.000000e+00> : vector<8x96xf32>
    %7 = tpu.matmul %6, %5, %cst {dimension_numbers = #tpu.dot_dimension_numbers<[1], [0], [0], [1], [0, 0, 1, 1], [], []>} : vector<8x32xbf16>, vector<32x96xbf16>, vector<8x96xf32> -> vector<8x96xf32>
    %c0_5 = arith.constant 0 : index
    %c0_6 = arith.constant 0 : index
    %c0_7 = arith.constant 0 : index
    %8 = vector.load %arg7[%c0_5, %c0_6, %c0_7] : memref<1x1x96xf32, #tpu.memory_space<vmem>>, vector<1x1x96xf32>
    %9 = vector.shape_cast %8 : vector<1x1x96xf32> to vector<1x96xf32>
    %10 = vector.broadcast %9 : vector<1x96xf32> to vector<8x96xf32>
    %11 = arith.addf %7, %10 : vector<8x96xf32>
    %12 = vector.extract_strided_slice %11 {offsets = [0, 0], sizes = [8, 16], strides = [1, 1]} : vector<8x96xf32> to vector<8x16xf32>
    %13 = vector.shape_cast %12 : vector<8x16xf32> to vector<1x8x16xf32>
    %14 = vector.extract_strided_slice %11 {offsets = [0, 16], sizes = [8, 16], strides = [1, 1]} : vector<8x96xf32> to vector<8x16xf32>
    %15 = vector.shape_cast %14 : vector<8x16xf32> to vector<1x8x16xf32>
    %16 = vector.shape_cast %13 : vector<1x8x16xf32> to vector<1x1x8x16xf32>
    %17 = vector.shape_cast %15 : vector<1x8x16xf32> to vector<1x1x8x16xf32>
    %18 = tpu.concatenate %16, %17 in 1 : vector<1x1x8x16xf32>, vector<1x1x8x16xf32> -> vector<1x2x8x16xf32>
    %19 = vector.shape_cast %18 : vector<1x2x8x16xf32> to vector<2x8x16xf32>
    %cst_8 = arith.constant 2.500000e-01 : f32
    %20 = vector.broadcast %cst_8 : f32 to vector<2x8x16xf32>
    %21 = arith.mulf %19, %20 : vector<2x8x16xf32>
    %22 = arith.truncf %21 : vector<2x8x16xf32> to vector<2x8x16xbf16>
    %23 = vector.extract_strided_slice %11 {offsets = [0, 32], sizes = [8, 16], strides = [1, 1]} : vector<8x96xf32> to vector<8x16xf32>
    %24 = vector.shape_cast %23 : vector<8x16xf32> to vector<1x8x16xf32>
    %25 = vector.extract_strided_slice %11 {offsets = [0, 48], sizes = [8, 16], strides = [1, 1]} : vector<8x96xf32> to vector<8x16xf32>
    %26 = vector.shape_cast %25 : vector<8x16xf32> to vector<1x8x16xf32>
    %27 = vector.shape_cast %24 : vector<1x8x16xf32> to vector<1x1x8x16xf32>
    %28 = vector.shape_cast %26 : vector<1x8x16xf32> to vector<1x1x8x16xf32>
    %29 = tpu.concatenate %27, %28 in 1 : vector<1x1x8x16xf32>, vector<1x1x8x16xf32> -> vector<1x2x8x16xf32>
    %30 = vector.shape_cast %29 : vector<1x2x8x16xf32> to vector<2x8x16xf32>
    %31 = arith.truncf %30 : vector<2x8x16xf32> to vector<2x8x16xbf16>
    %32 = vector.extract_strided_slice %11 {offsets = [0, 64], sizes = [8, 16], strides = [1, 1]} : vector<8x96xf32> to vector<8x16xf32>
    %33 = vector.shape_cast %32 : vector<8x16xf32> to vector<1x8x16xf32>
    %34 = vector.extract_strided_slice %11 {offsets = [0, 80], sizes = [8, 16], strides = [1, 1]} : vector<8x96xf32> to vector<8x16xf32>
    %35 = vector.shape_cast %34 : vector<8x16xf32> to vector<1x8x16xf32>
    %36 = vector.shape_cast %33 : vector<1x8x16xf32> to vector<1x1x8x16xf32>
    %37 = vector.shape_cast %35 : vector<1x8x16xf32> to vector<1x1x8x16xf32>
    %38 = tpu.concatenate %36, %37 in 1 : vector<1x1x8x16xf32>, vector<1x1x8x16xf32> -> vector<1x2x8x16xf32>
    %39 = vector.shape_cast %38 : vector<1x2x8x16xf32> to vector<2x8x16xf32>
    %40 = arith.truncf %39 : vector<2x8x16xf32> to vector<2x8x16xbf16>
    "tpu.trace_start"() <{level = 10 : i32, message = "bqd,bkd->bqk"}> : () -> ()
    %cst_9 = arith.constant dense<0.000000e+00> : vector<2x8x8xf32>
    %41 = tpu.matmul %22, %31, %cst_9 {dimension_numbers = #tpu.dot_dimension_numbers<[2], [2], [1], [1], [0, 0, 0, 1, 1, 1], [0], [0]>} : vector<2x8x16xbf16>, vector<2x8x16xbf16>, vector<2x8x8xf32> -> vector<2x8x8xf32>
    "tpu.trace_stop"() : () -> ()
    %42 = vector.shape_cast %41 : vector<2x8x8xf32> to vector<1x2x8x8xf32>
    %c0_10 = arith.constant 0 : index
    %c0_11 = arith.constant 0 : index
    %c0_12 = arith.constant 0 : index
    %43 = vector.load %arg3[%c0_10, %c0_11, %c0_12] : memref<1x1x8xf32, #tpu.memory_space<vmem>>, vector<1x1x8xf32>
    %44 = vector.shape_cast %43 : vector<1x1x8xf32> to vector<1x1x1x8xf32>
    %45 = vector.broadcast %44 : vector<1x1x1x8xf32> to vector<1x2x8x8xf32>
    %46 = arith.addf %42, %45 : vector<1x2x8x8xf32>
    %cst_13 = arith.constant dense<0xFF800000> : vector<1x2x8xf32>
    %47 = vector.multi_reduction <maximumf>, %46, %cst_13 [3] : vector<1x2x8x8xf32> to vector<1x2x8xf32>
    %48 = vector.shape_cast %47 : vector<1x2x8xf32> to vector<1x2x8x1xf32>
    %49 = vector.broadcast %48 : vector<1x2x8x1xf32> to vector<1x2x8x8xf32>
    %50 = arith.subf %46, %49 : vector<1x2x8x8xf32>
    %51 = math.exp %50 : vector<1x2x8x8xf32>
    %cst_14 = arith.constant dense<0.000000e+00> : vector<1x2x8xf32>
    %52 = vector.multi_reduction <add>, %51, %cst_14 [3] : vector<1x2x8x8xf32> to vector<1x2x8xf32>
    %53 = vector.shape_cast %52 : vector<1x2x8xf32> to vector<1x2x8x1xf32>
    %54 = tpu.reciprocal %53 {approx = true} : vector<1x2x8x1xf32> -> vector<1x2x8x1xf32>
    %55 = vector.broadcast %54 : vector<1x2x8x1xf32> to vector<1x2x8x8xf32>
    %56 = arith.mulf %51, %55 : vector<1x2x8x8xf32>
    %57 = vector.shape_cast %56 : vector<1x2x8x8xf32> to vector<2x8x8xf32>
    %58 = arith.truncf %57 : vector<2x8x8xf32> to vector<2x8x8xbf16>
    "tpu.trace_start"() <{level = 10 : i32, message = "bqk,bkd->bqd"}> : () -> ()
    %cst_15 = arith.constant dense<0.000000e+00> : vector<2x8x16xf32>
    %59 = tpu.matmul %58, %40, %cst_15 {dimension_numbers = #tpu.dot_dimension_numbers<[2], [1], [1], [2], [0, 0, 0, 1, 1, 2], [0], [0]>} : vector<2x8x8xbf16>, vector<2x8x16xbf16>, vector<2x8x16xf32> -> vector<2x8x16xf32>
    "tpu.trace_stop"() : () -> ()
    %60 = vector.shape_cast %59 : vector<2x8x16xf32> to vector<1x2x8x16xf32>
    %61 = vector.extract_strided_slice %60 {offsets = [0, 0, 0, 0], sizes = [1, 1, 8, 16], strides = [1, 1, 1, 1]} : vector<1x2x8x16xf32> to vector<1x1x8x16xf32>
    %62 = vector.shape_cast %61 : vector<1x1x8x16xf32> to vector<1x8x16xf32>
    %63 = vector.shape_cast %62 : vector<1x8x16xf32> to vector<8x16xf32>
    %64 = vector.extract_strided_slice %60 {offsets = [0, 1, 0, 0], sizes = [1, 1, 8, 16], strides = [1, 1, 1, 1]} : vector<1x2x8x16xf32> to vector<1x1x8x16xf32>
    %65 = vector.shape_cast %64 : vector<1x1x8x16xf32> to vector<1x8x16xf32>
    %66 = vector.shape_cast %65 : vector<1x8x16xf32> to vector<8x16xf32>
    %67 = tpu.concatenate %63, %66 in 1 : vector<8x16xf32>, vector<8x16xf32> -> vector<8x32xf32>
    %c0_16 = arith.constant 0 : index
    %c0_17 = arith.constant 0 : index
    %c0_18 = arith.constant 0 : index
    %68 = vector.load %arg8[%c0_16, %c0_17, %c0_18] : memref<1x32x32xbf16, #tpu.memory_space<vmem>>, vector<1x32x32xbf16>
    %69 = vector.shape_cast %68 : vector<1x32x32xbf16> to vector<32x32xbf16>
    %70 = arith.truncf %67 : vector<8x32xf32> to vector<8x32xbf16>
    %cst_19 = arith.constant dense<0.000000e+00> : vector<8x32xf32>
    %71 = tpu.matmul %70, %69, %cst_19 {dimension_numbers = #tpu.dot_dimension_numbers<[1], [0], [0], [1], [0, 0, 1, 1], [], []>} : vector<8x32xbf16>, vector<32x32xbf16>, vector<8x32xf32> -> vector<8x32xf32>
    %72 = arith.addf %3, %71 : vector<8x32xf32>
    %c0_20 = arith.constant 0 : index
    %c0_21 = arith.constant 0 : index
    %c0_22 = arith.constant 0 : index
    %73 = vector.load %arg9[%c0_20, %c0_21, %c0_22] : memref<1x1x32xf32, #tpu.memory_space<vmem>>, vector<1x1x32xf32>
    %74 = vector.shape_cast %73 : vector<1x1x32xf32> to vector<1x32xf32>
    %75 = vector.broadcast %74 : vector<1x32xf32> to vector<8x32xf32>
    %76 = arith.addf %72, %75 : vector<8x32xf32>
    %c0_23 = arith.constant 0 : index
    %c0_24 = arith.constant 0 : index
    %c0_25 = arith.constant 0 : index
    %77 = vector.load %arg10[%c0_23, %c0_24, %c0_25] : memref<1x1x32xf32, #tpu.memory_space<vmem>>, vector<1x1x32xf32>
    %78 = vector.shape_cast %77 : vector<1x1x32xf32> to vector<1x32xf32>
    %c0_26 = arith.constant 0 : index
    %c0_27 = arith.constant 0 : index
    %c0_28 = arith.constant 0 : index
    %79 = vector.load %arg11[%c0_26, %c0_27, %c0_28] : memref<1x1x32xf32, #tpu.memory_space<vmem>>, vector<1x1x32xf32>
    %80 = vector.shape_cast %79 : vector<1x1x32xf32> to vector<1x32xf32>
    %cst_29 = arith.constant dense<0.000000e+00> : vector<8xf32>
    %81 = vector.multi_reduction <add>, %76, %cst_29 [1] : vector<8x32xf32> to vector<8xf32>
    %82 = vector.shape_cast %81 : vector<8xf32> to vector<8x1xf32>
    %cst_30 = arith.constant 3.200000e+01 : f32
    %83 = vector.broadcast %cst_30 : f32 to vector<8x1xf32>
    %84 = arith.divf %82, %83 : vector<8x1xf32>
    %85 = vector.broadcast %84 : vector<8x1xf32> to vector<8x32xf32>
    %86 = arith.subf %76, %85 : vector<8x32xf32>
    %87 = arith.mulf %86, %86 : vector<8x32xf32>
    %cst_31 = arith.constant dense<0.000000e+00> : vector<8xf32>
    %88 = vector.multi_reduction <add>, %87, %cst_31 [1] : vector<8x32xf32> to vector<8xf32>
    %89 = vector.shape_cast %88 : vector<8xf32> to vector<8x1xf32>
    %cst_32 = arith.constant 3.200000e+01 : f32
    %90 = vector.broadcast %cst_32 : f32 to vector<8x1xf32>
    %91 = arith.divf %89, %90 : vector<8x1xf32>
    %cst_33 = arith.constant 9.99999996E-13 : f32
    %92 = vector.broadcast %cst_33 : f32 to vector<8x1xf32>
    %93 = arith.addf %91, %92 : vector<8x1xf32>
    %94 = math.rsqrt %93 : vector<8x1xf32>
    %95 = vector.broadcast %94 : vector<8x1xf32> to vector<8x32xf32>
    %96 = arith.mulf %86, %95 : vector<8x32xf32>
    %97 = vector.broadcast %78 : vector<1x32xf32> to vector<8x32xf32>
    %98 = arith.mulf %96, %97 : vector<8x32xf32>
    %99 = vector.broadcast %80 : vector<1x32xf32> to vector<8x32xf32>
    %100 = arith.addf %98, %99 : vector<8x32xf32>
    %c0_34 = arith.constant 0 : index
    %c0_35 = arith.constant 0 : index
    %c0_36 = arith.constant 0 : index
    %101 = vector.load %arg12[%c0_34, %c0_35, %c0_36] : memref<1x32x64xbf16, #tpu.memory_space<vmem>>, vector<1x32x64xbf16>
    %102 = vector.shape_cast %101 : vector<1x32x64xbf16> to vector<32x64xbf16>
    %103 = arith.truncf %100 : vector<8x32xf32> to vector<8x32xbf16>
    %cst_37 = arith.constant dense<0.000000e+00> : vector<8x64xf32>
    %104 = tpu.matmul %103, %102, %cst_37 {dimension_numbers = #tpu.dot_dimension_numbers<[1], [0], [0], [1], [0, 0, 1, 1], [], []>} : vector<8x32xbf16>, vector<32x64xbf16>, vector<8x64xf32> -> vector<8x64xf32>
    %c0_38 = arith.constant 0 : index
    %c0_39 = arith.constant 0 : index
    %c0_40 = arith.constant 0 : index
    %105 = vector.load %arg13[%c0_38, %c0_39, %c0_40] : memref<1x1x64xf32, #tpu.memory_space<vmem>>, vector<1x1x64xf32>
    %106 = vector.shape_cast %105 : vector<1x1x64xf32> to vector<1x64xf32>
    %107 = vector.broadcast %106 : vector<1x64xf32> to vector<8x64xf32>
    %108 = arith.addf %104, %107 : vector<8x64xf32>
    %cst_41 = arith.constant 5.000000e-01 : f32
    %109 = vector.broadcast %cst_41 : f32 to vector<8x64xf32>
    %110 = arith.mulf %109, %108 : vector<8x64xf32>
    %cst_42 = arith.constant 4.471500e-02 : f32
    %111 = vector.broadcast %cst_42 : f32 to vector<8x64xf32>
    %112 = arith.mulf %111, %108 : vector<8x64xf32>
    %113 = arith.mulf %112, %108 : vector<8x64xf32>
    %114 = arith.mulf %113, %108 : vector<8x64xf32>
    %115 = arith.addf %108, %114 : vector<8x64xf32>
    %cst_43 = arith.constant 0.797884583 : f32
    %116 = vector.broadcast %cst_43 : f32 to vector<8x64xf32>
    %117 = arith.mulf %116, %115 : vector<8x64xf32>
    %118 = math.tanh %117 : vector<8x64xf32>
    %cst_44 = arith.constant 1.000000e+00 : f32
    %119 = vector.broadcast %cst_44 : f32 to vector<8x64xf32>
    %120 = arith.addf %119, %118 : vector<8x64xf32>
    %121 = arith.mulf %110, %120 : vector<8x64xf32>
    %c0_45 = arith.constant 0 : index
    %c0_46 = arith.constant 0 : index
    %c0_47 = arith.constant 0 : index
    %122 = vector.load %arg14[%c0_45, %c0_46, %c0_47] : memref<1x64x32xbf16, #tpu.memory_space<vmem>>, vector<1x64x32xbf16>
    %123 = vector.shape_cast %122 : vector<1x64x32xbf16> to vector<64x32xbf16>
    %124 = arith.truncf %121 : vector<8x64xf32> to vector<8x64xbf16>
    %cst_48 = arith.constant dense<0.000000e+00> : vector<8x32xf32>
    %125 = tpu.matmul %124, %123, %cst_48 {dimension_numbers = #tpu.dot_dimension_numbers<[1], [0], [0], [1], [0, 0, 1, 1], [], []>} : vector<8x64xbf16>, vector<64x32xbf16>, vector<8x32xf32> -> vector<8x32xf32>
    %126 = arith.addf %100, %125 : vector<8x32xf32>
    %c0_49 = arith.constant 0 : index
    %c0_50 = arith.constant 0 : index
    %c0_51 = arith.constant 0 : index
    %127 = vector.load %arg15[%c0_49, %c0_50, %c0_51] : memref<1x1x32xf32, #tpu.memory_space<vmem>>, vector<1x1x32xf32>
    %128 = vector.shape_cast %127 : vector<1x1x32xf32> to vector<1x32xf32>
    %129 = vector.broadcast %128 : vector<1x32xf32> to vector<8x32xf32>
    %130 = arith.addf %126, %129 : vector<8x32xf32>
    %c0_52 = arith.constant 0 : index
    %c0_53 = arith.constant 0 : index
    %c0_54 = arith.constant 0 : index
    %131 = vector.load %arg16[%c0_52, %c0_53, %c0_54] : memref<1x1x32xf32, #tpu.memory_space<vmem>>, vector<1x1x32xf32>
    %132 = vector.shape_cast %131 : vector<1x1x32xf32> to vector<1x32xf32>
    %c0_55 = arith.constant 0 : index
    %c0_56 = arith.constant 0 : index
    %c0_57 = arith.constant 0 : index
    %133 = vector.load %arg17[%c0_55, %c0_56, %c0_57] : memref<1x1x32xf32, #tpu.memory_space<vmem>>, vector<1x1x32xf32>
    %134 = vector.shape_cast %133 : vector<1x1x32xf32> to vector<1x32xf32>
    %cst_58 = arith.constant dense<0.000000e+00> : vector<8xf32>
    %135 = vector.multi_reduction <add>, %130, %cst_58 [1] : vector<8x32xf32> to vector<8xf32>
    %136 = vector.shape_cast %135 : vector<8xf32> to vector<8x1xf32>
    %cst_59 = arith.constant 3.200000e+01 : f32
    %137 = vector.broadcast %cst_59 : f32 to vector<8x1xf32>
    %138 = arith.divf %136, %137 : vector<8x1xf32>
    %139 = vector.broadcast %138 : vector<8x1xf32> to vector<8x32xf32>
    %140 = arith.subf %130, %139 : vector<8x32xf32>
    %141 = arith.mulf %140, %140 : vector<8x32xf32>
    %cst_60 = arith.constant dense<0.000000e+00> : vector<8xf32>
    %142 = vector.multi_reduction <add>, %141, %cst_60 [1] : vector<8x32xf32> to vector<8xf32>
    %143 = vector.shape_cast %142 : vector<8xf32> to vector<8x1xf32>
    %cst_61 = arith.constant 3.200000e+01 : f32
    %144 = vector.broadcast %cst_61 : f32 to vector<8x1xf32>
    %145 = arith.divf %143, %144 : vector<8x1xf32>
    %cst_62 = arith.constant 9.99999996E-13 : f32
    %146 = vector.broadcast %cst_62 : f32 to vector<8x1xf32>
    %147 = arith.addf %145, %146 : vector<8x1xf32>
    %148 = math.rsqrt %147 : vector<8x1xf32>
    %149 = vector.broadcast %148 : vector<8x1xf32> to vector<8x32xf32>
    %150 = arith.mulf %140, %149 : vector<8x32xf32>
    %151 = vector.broadcast %132 : vector<1x32xf32> to vector<8x32xf32>
    %152 = arith.mulf %150, %151 : vector<8x32xf32>
    %153 = vector.broadcast %134 : vector<1x32xf32> to vector<8x32xf32>
    %154 = arith.addf %152, %153 : vector<8x32xf32>
    %c0_63 = arith.constant 0 : index
    %c0_64 = arith.constant 0 : index
    %155 = vector.load %arg23[%c0_63, %c0_64] : memref<8x32xf32, #tpu.memory_space<vmem>>, vector<8x32xf32>
    tpu.vector_store %arg23[%c0_63, %c0_64], %154 {strides = array<i32>} : memref<8x32xf32, #tpu.memory_space<vmem>>, vector<8x32xf32>,
    %c1_i32 = arith.constant 1 : i32
    %156 = arith.cmpi eq, %arg1, %c1_i32 : i32
    %157 = arith.extui %156 : i1 to i32
    %c0_i32_65 = arith.constant 0 : i32
    %158 = arith.cmpi ne, %157, %c0_i32_65 : i32
    scf.if %158 {
      %159 = vector.shape_cast %154 : vector<8x32xf32> to vector<1x8x32xf32>
      %160 = vector.extract_strided_slice %159 {offsets = [0, 0, 0], sizes = [1, 1, 32], strides = [1, 1, 1]} : vector<1x8x32xf32> to vector<1x1x32xf32>
      %161 = vector.shape_cast %160 : vector<1x1x32xf32> to vector<1x32xf32>
      %c0_66 = arith.constant 0 : index
      %c0_67 = arith.constant 0 : index
      %162 = vector.load %arg18[%c0_66, %c0_67] : memref<32x32xbf16, #tpu.memory_space<vmem>>, vector<32x32xbf16>
      %163 = arith.truncf %161 : vector<1x32xf32> to vector<1x32xbf16>
      %cst_68 = arith.constant dense<0.000000e+00> : vector<1x32xf32>
      %164 = tpu.matmul %163, %162, %cst_68 {dimension_numbers = #tpu.dot_dimension_numbers<[1], [0], [0], [1], [0, 0, 1, 1], [], []>} : vector<1x32xbf16>, vector<32x32xbf16>, vector<1x32xf32> -> vector<1x32xf32>
      %c0_69 = arith.constant 0 : index
      %c0_70 = arith.constant 0 : index
      %165 = vector.load %arg19[%c0_69, %c0_70] : memref<1x32xf32, #tpu.memory_space<vmem>>, vector<1x32xf32>
      %166 = arith.addf %164, %165 : vector<1x32xf32>
      %167 = math.tanh %166 : vector<1x32xf32>
      %c0_71 = arith.constant 0 : index
      %c0_72 = arith.constant 0 : index
      %168 = vector.load %arg20[%c0_71, %c0_72] : memref<32x128xbf16, #tpu.memory_space<vmem>>, vector<32x128xbf16>
      %169 = arith.truncf %167 : vector<1x32xf32> to vector<1x32xbf16>
      %cst_73 = arith.constant dense<0.000000e+00> : vector<1x128xf32>
      %170 = tpu.matmul %169, %168, %cst_73 {dimension_numbers = #tpu.dot_dimension_numbers<[1], [0], [0], [1], [0, 0, 1, 1], [], []>} : vector<1x32xbf16>, vector<32x128xbf16>, vector<1x128xf32> -> vector<1x128xf32>
      %c0_74 = arith.constant 0 : index
      %c0_75 = arith.constant 0 : index
      %171 = vector.load %arg21[%c0_74, %c0_75] : memref<1x128xf32, #tpu.memory_space<vmem>>, vector<1x128xf32>
      %172 = arith.addf %170, %171 : vector<1x128xf32>
      %173 = vector.shape_cast %172 : vector<1x128xf32> to vector<1x1x128xf32>
      %c0_76 = arith.constant 0 : index
      %c0_77 = arith.constant 0 : index
      %c0_78 = arith.constant 0 : index
      %174 = vector.load %arg22[%c0_76, %c0_77, %c0_78] : memref<1x1x128xf32, #tpu.memory_space<vmem>>, vector<1x1x128xf32>
      tpu.vector_store %arg22[%c0_76, %c0_77, %c0_78], %173 {strides = array<i32>} : memref<1x1x128xf32, #tpu.memory_space<vmem>>, vector<1x1x128xf32>,
    } else {
    }
    return
  }
  func.func @transform_0(%arg0: i32, %arg1: i32) -> (i32, i32) {
    %c0_i32 = arith.constant 0 : i32
    %c0_i32_0 = arith.constant 0 : i32
    return %arg0, %c0_i32 : i32, i32
  }
  func.func @transform_1(%arg0: i32, %arg1: i32) -> (i32, i32, i32) {
    %c0_i32 = arith.constant 0 : i32
    %c0_i32_0 = arith.constant 0 : i32
    %c0_i32_1 = arith.constant 0 : i32
    return %arg0, %c0_i32, %c0_i32_0 : i32, i32, i32
  }
  func.func @transform_2(%arg0: i32, %arg1: i32) -> (i32, i32) {
    %c0_i32 = arith.constant 0 : i32
    %c0_i32_0 = arith.constant 0 : i32
    %c0_i32_1 = arith.constant 0 : i32
    return %c0_i32, %c0_i32_0 : i32, i32
  }
  func.func @transform_3(%arg0: i32, %arg1: i32) -> (i32, i32) {
    %c0_i32 = arith.constant 0 : i32
    %c0_i32_0 = arith.constant 0 : i32
    %c0_i32_1 = arith.constant 0 : i32
    return %c0_i32, %c0_i32_0 : i32, i32
  }
  func.func @transform_4(%arg0: i32, %arg1: i32) -> (i32, i32, i32) {
    %c0_i32 = arith.constant 0 : i32
    %c0_i32_0 = arith.constant 0 : i32
    %c0_i32_1 = arith.constant 0 : i32
    return %arg1, %c0_i32, %c0_i32_0 : i32, i32, i32
  }
  func.func @transform_5(%arg0: i32, %arg1: i32) -> (i32, i32, i32) {
    %c0_i32 = arith.constant 0 : i32
    %c0_i32_0 = arith.constant 0 : i32
    %c0_i32_1 = arith.constant 0 : i32
    return %arg1, %c0_i32, %c0_i32_0 : i32, i32, i32
  }
  func.func @transform_6(%arg0: i32, %arg1: i32) -> (i32, i32, i32) {
    %c0_i32 = arith.constant 0 : i32
    %c0_i32_0 = arith.constant 0 : i32
    %c0_i32_1 = arith.constant 0 : i32
    return %arg1, %c0_i32, %c0_i32_0 : i32, i32, i32
  }
  func.func @transform_7(%arg0: i32, %arg1: i32) -> (i32, i32, i32) {
    %c0_i32 = arith.constant 0 : i32
    %c0_i32_0 = arith.constant 0 : i32
    %c0_i32_1 = arith.constant 0 : i32
    return %arg1, %c0_i32, %c0_i32_0 : i32, i32, i32
  }
  func.func @transform_8(%arg0: i32, %arg1: i32) -> (i32, i32, i32) {
    %c0_i32 = arith.constant 0 : i32
    %c0_i32_0 = arith.constant 0 : i32
    %c0_i32_1 = arith.constant 0 : i32
    return %arg1, %c0_i32, %c0_i32_0 : i32, i32, i32
  }
  func.func @transform_9(%arg0: i32, %arg1: i32) -> (i32, i32, i32) {
    %c0_i32 = arith.constant 0 : i32
    %c0_i32_0 = arith.constant 0 : i32
    %c0_i32_1 = arith.constant 0 : i32
    return %arg1, %c0_i32, %c0_i32_0 : i32, i32, i32
  }
  func.func @transform_10(%arg0: i32, %arg1: i32) -> (i32, i32, i32) {
    %c0_i32 = arith.constant 0 : i32
    %c0_i32_0 = arith.constant 0 : i32
    %c0_i32_1 = arith.constant 0 : i32
    return %arg1, %c0_i32, %c0_i32_0 : i32, i32, i32
  }
  func.func @transform_11(%arg0: i32, %arg1: i32) -> (i32, i32, i32) {
    %c0_i32 = arith.constant 0 : i32
    %c0_i32_0 = arith.constant 0 : i32
    %c0_i32_1 = arith.constant 0 : i32
    return %arg1, %c0_i32, %c0_i32_0 : i32, i32, i32
  }
  func.func @transform_12(%arg0: i32, %arg1: i32) -> (i32, i32, i32) {
    %c0_i32 = arith.constant 0 : i32
    %c0_i32_0 = arith.constant 0 : i32
    %c0_i32_1 = arith.constant 0 : i32
    return %arg1, %c0_i32, %c0_i32_0 : i32, i32, i32
  }
  func.func @transform_13(%arg0: i32, %arg1: i32) -> (i32, i32, i32) {
    %c0_i32 = arith.constant 0 : i32
    %c0_i32_0 = arith.constant 0 : i32
    %c0_i32_1 = arith.constant 0 : i32
    return %arg1, %c0_i32, %c0_i32_0 : i32, i32, i32
  }
  func.func @transform_14(%arg0: i32, %arg1: i32) -> (i32, i32, i32) {
    %c0_i32 = arith.constant 0 : i32
    %c0_i32_0 = arith.constant 0 : i32
    %c0_i32_1 = arith.constant 0 : i32
    return %arg1, %c0_i32, %c0_i32_0 : i32, i32, i32
  }
  func.func @transform_15(%arg0: i32, %arg1: i32) -> (i32, i32, i32) {
    %c0_i32 = arith.constant 0 : i32
    %c0_i32_0 = arith.constant 0 : i32
    %c0_i32_1 = arith.constant 0 : i32
    return %arg1, %c0_i32, %c0_i32_0 : i32, i32, i32
  }
  func.func @transform_16(%arg0: i32, %arg1: i32) -> (i32, i32) {
    %c0_i32 = arith.constant 0 : i32
    %c0_i32_0 = arith.constant 0 : i32
    %c0_i32_1 = arith.constant 0 : i32
    return %c0_i32, %c0_i32_0 : i32, i32
  }
  func.func @transform_17(%arg0: i32, %arg1: i32) -> (i32, i32) {
    %c0_i32 = arith.constant 0 : i32
    %c0_i32_0 = arith.constant 0 : i32
    %c0_i32_1 = arith.constant 0 : i32
    return %c0_i32, %c0_i32_0 : i32, i32
  }
  func.func @transform_18(%arg0: i32, %arg1: i32) -> (i32, i32) {
    %c0_i32 = arith.constant 0 : i32
    %c0_i32_0 = arith.constant 0 : i32
    %c0_i32_1 = arith.constant 0 : i32
    return %c0_i32, %c0_i32_0 : i32, i32
  }
  func.func @transform_19(%arg0: i32, %arg1: i32) -> (i32, i32) {
    %c0_i32 = arith.constant 0 : i32
    %c0_i32_0 = arith.constant 0 : i32
    %c0_i32_1 = arith.constant 0 : i32
    return %c0_i32, %c0_i32_0 : i32, i32
  }
  func.func @transform_20(%arg0: i32, %arg1: i32) -> (i32, i32, i32) {
    %c0_i32 = arith.constant 0 : i32
    %c0_i32_0 = arith.constant 0 : i32
    %c0_i32_1 = arith.constant 0 : i32
    return %arg0, %c0_i32, %c0_i32_0 : i32, i32, i32
  }
}

</mosaic_0001>

<bundles_post_ra>
// kernel: forward.1
= control target key start
LH: loop header
LB: loop body
LE: loop exit
PB: predicated region body
PF: predicated region fallthrough
CT: control target
= control target key end

     0   :  { %s2636_s0 = inlined_call_operand.vmem [shape: f32[16,32], index: 0, kind: input, shape index: {}]   ;;  %s2637_s1 = inlined_call_operand.vmem [shape: f32[2,1,8], index: 1, kind: input, shape index: {}]   ;;  %s2638_s2 = inlined_call_operand.vmem [shape: f32[1,32], index: 2, kind: input, shape index: {}]   ;;  %s2639_s3 = inlined_call_operand.vmem [shape: f32[1,32], index: 3, kind: input, shape index: {}]   ;;  %s2640_s4 = inlined_call_operand.vmem [shape: bf16[2,32,96], index: 4, kind: input, shape index: {}]   ;;  %s2641_s5 = inlined_call_operand.vmem [shape: f32[2,1,96], index: 5, kind: input, shape index: {}]   ;;  %s2642_s6 = inlined_call_operand.vmem [shape: bf16[2,32,32], index: 6, kind: input, shape index: {}]   ;;  %s2643_s7 = inlined_call_operand.vmem [shape: f32[2,1,32], index: 7, kind: input, shape index: {}]   ;;  %s2644_s8 = inlined_call_operand.vmem [shape: f32[2,1,32], index: 8, kind: input, shape index: {}]   ;;  %s2645_s9 = inlined_call_operand.vmem [shape: f32[2,1,32], index: 9, kind: input, shape index: {}]   ;;  %s2646_s10 = inlined_call_operand.vmem [shape: bf16[2,32,64], index: 10, kind: input, shape index: {}]   ;;  %s2647_s11 = inlined_call_operand.vmem [shape: f32[2,1,64], index: 11, kind: input, shape index: {}]   ;;  %s2648_s12 = inlined_call_operand.vmem [shape: bf16[2,64,32], index: 12, kind: input, shape index: {}]   ;;  %s2649_s13 = inlined_call_operand.vmem [shape: f32[2,1,32], index: 13, kind: input, shape index: {}]   ;;  %s2650_s14 = inlined_call_operand.vmem [shape: f32[2,1,32], index: 14, kind: input, shape index: {}]   ;;  %s2651_s15 = inlined_call_operand.vmem [shape: f32[2,1,32], index: 15, kind: input, shape index: {}]   ;;  %s2652_s16 = inlined_call_operand.vmem [shape: bf16[32,32], index: 16, kind: input, shape index: {}]   ;;  %s2653_s17 = inlined_call_operand.vmem [shape: f32[1,32], index: 17, kind: input, shape index: {}]   ;;  %s2654_s18 = inlined_call_operand.vmem [shape: bf16[32,128], index: 18, kind: input, shape index: {}]   ;;  %s2655_s19 = inlined_call_operand.vmem [shape: f32[1,128], index: 19, kind: input, shape index: {}]   ;;  %s2656_s20 = inlined_call_operand.hbm [shape: f32[2,1,128], index: 20, kind: output, shape index: {}]  }
   0x1   :  { %2672 = sst [smem:[#allocation18_spill]] %s2636_s0 }
   0x2   :  { %2673 = sst [smem:[#allocation19_spill]] %s2637_s1 }
   0x3   :  { %2674 = sst [smem:[#allocation20_spill]] %s2638_s2 }
   0x4   :  { %2675 = sst [smem:[#allocation21_spill]] %s2639_s3 }
   0x5   :  { %2676 = sst [smem:[#allocation22_spill]] %s2640_s4 }
   0x6   :  { %2677 = sst [smem:[#allocation23_spill]] %s2642_s6 }
   0x7   :  { %2678 = sst [smem:[#allocation24_spill]] %s2645_s9 }
   0x8   :  { %2679 = sst [smem:[#allocation25_spill]] %s2646_s10 }
   0x9   :  { %2680 = sst [smem:[#allocation26_spill]] %s2650_s14 }
   0xa   :  { %2681 = sst [smem:[#allocation27_spill]] %s2651_s15 }
   0xb   :  { %2682 = sst [smem:[#allocation28_spill]] %s2652_s16 }
   0xc   :  { %2683 = sst [smem:[#allocation29_spill]] %s2653_s17 }
   0xd   :  { %2684 = sst [smem:[#allocation30_spill]] %s2654_s18 }
   0xe   :  { %2685 = sst [smem:[#allocation31_spill]] %s2655_s19 }
   0xf   :  { %2686 = sst [smem:[#allocation32_spill]] %s2656_s20 }
  0x10   :  { %25 = vsyncpa [#allocation4], 0 }
  0x11   :  { %27 = vsyncpa [#allocation4 + $0x1], 0  ;;  %s2302_s1 = smov 0   ;;  %s2304_s22 = smov 0  }
  0x12   :  { %s2306_s23 = smov 0   ;;  %s2308_s24 = smov 0  }
  0x13   :  { %s2310_s2 = smov 0   ;;  %s2312_s25 = smov 0  }
  0x14   :  { %s2314_s3 = smov 0   ;;  %s2316_s26 = smov 0  }
  0x15 LB: > { %2687 = sst [smem:[#allocation6_spill]] %s2158_s1  ;;  %s1821_s27 = sadd.s32 4294967295, %s2186_s26   ;;  %s2186_s26 = sphi %s2316_s26, %s33_s26   ;;  %s2182_s3 = sphi %s2314_s3, %s2740_s3   ;;  %s2178_s25 = sphi %s2312_s25, %s2743_s25   ;;  %s2174_s2 = sphi %s2310_s2, %s2738_s2   ;;  %s2170_s24 = sphi %s2308_s24, %s2737_s24   ;;  %s2166_s23 = sphi %s2306_s23, %s2736_s23   ;;  %s2162_s22 = sphi %s2304_s22, %s2742_s22   ;;  %s2158_s1 = sphi %s2302_s1, %s2741_s1  }
  0x16   : > { %2688 = sst [smem:[#allocation7_spill]] %s2166_s23  ;;  %s1822_s28 = sadd.s32 4294967294, %s2186_s26  }
  0x17   : > { %2689 = sst [smem:[#allocation8_spill]] %s2170_s24  ;;  %s42_s4 = sadd.s32 1, %s2178_s25 }
  0x18   : > { %2690 = sst [smem:[#allocation9_spill]] %s2174_s2  ;;  %p43_p0 = scmp.ge.s32.totalorder %s42_s4, 2 }
  0x19   : > { %2691 = sst [smem:[#allocation10_spill]] %s2178_s25  ;;  %s45_s29 = sadd.s32 1, %s2182_s3 }
  0x1a   : > { %2692 = sst [smem:[#allocation11_spill]] %s2182_s3  ;;  %p552_p1 = scmp.ne.s32.totalorder %s2166_s23, %s2162_s22 }
  0x1b   : > { %2693 = sst [smem:[#allocation12_spill]] %s2186_s26  ;;  %p553_p2 = scmp.eq.s32.totalorder %s1821_s27, 3 }
  0x1c   : > { %s2745_s4 = smov (%p43_p0, %s42_s4), 0  ;;  %s2747_s29 = smov (!%p43_p0, %s45_s29), %s2182_s3 }
  0x1d   : > { %2694 = sst [smem:[#allocation13_spill]] %s2745_s4  ;;  %p2351_p3 = por %p553_p2, %p552_p1 }
  0x1e   : > { %p558_p4 = scmp.ne.s32.totalorder %s2162_s22, %s2158_s1  ;;  %p47_p5 = scmp.ge.s32.totalorder %s2747_s29, 2 }
  0x1f   : > { %s2695_s30 = scalar_select %p2351_p3, 1, 0 }
  0x20   : > { %p559_p6 = scmp.eq.s32.totalorder %s1822_s28, 3  ;;  %p1825_p7 = scmp.ge.s32.totalorder %s2186_s26, 1 }
  0x21   : > { %2696 = sst [smem:[#allocation14_spill]] %s2695_s30  ;;  %p688_p8 = scmp.lt.s32.totalorder %s2186_s26, 5 }
  0x22   : > { %s2749_s29 = smov (%p47_p5, %s2747_s29), 0  ;;  %p2361_p9 = por %p559_p6, %p558_p4 }
  0x23   : > { %2697 = sst [smem:[#allocation15_spill]] %s2749_s29  ;;  %p689_p10 = pnand %p1825_p7, %p688_p8 }
  0x24   : > { %s2698_s0 = scalar_select %p2361_p9, 1, 0 }
  0x25   : > { %s539_s21 = ssub.s32 %s2182_s3, %s2749_s29  ;;  %s542_s27 = sadd.s32 1, %s2166_s23 }
  0x26   : > { %2699 = sst [smem:[#allocation16_spill]] %s2698_s0  ;;  %p540_p11 = scmp.eq.s32.totalorder %s539_s21, 0 }
  0x27   : > { %692 = sbr.rel (%p689_p10) target bundleno = 3320 (0xcf8), region = 100  ;;  %p791_p12 = scmp.lt.s32.totalorder (!%p689_p10), %s2174_s2, 1 }
  0x28   : > { %s2369_s4 = scalar_select %p540_p11, %s2166_s23, %s542_s27  }
  0x29   : > { %p798_p13 = scmp.lt.s32.totalorder (!%p689_p10), %s2170_s24, 1  ;;  %s2702_s1 = sld [smem:[#allocation18_spill]] (!%p689_p10) }
  0x2a   : > { %2700 = sst [smem:[#allocation17_spill]] %s2369_s4  ;;  %s2709_s14 = sand.u32 (!%p689_p10), 1, %s2162_s22  }
  0x2b   : > { %s2703_s19 = sld [smem:[#allocation22_spill]] (!%p689_p10)  ;;  %s2444_s15 = scalar_lea.vmem (!%p689_p10), [#allocation3], %s2709_s14 }
  0x2c   : > { %s2375_s25 = scalar_select %p791_p12, %s2174_s2, 1 }
  0x2d   : > { %s2378_s0 = scalar_select %p798_p13, %s2170_s24, 1 }
  0x2e   : > { %s1826_s21 = sshll.u32 %s2375_s25, 3  ;;  %s2704_s6 = sld [smem:[#allocation23_spill]] }
  0x2f   : > { %s794_s26 = scalar_lea.vmem %s2702_s1, %s1826_s21  ;;  %s1875_s20 = sshll.u32 %s2378_s0, 4 }
  0x30   : > { %s2706_s10 = sld [smem:[#allocation25_spill]]  ;;  %s835_s23 = scalar_lea.vmem %s2649_s13, %s2378_s0 }
  0x31   : > { %s2392_s17 = scalar_lea.vmem %s2703_s19, %s1875_s20  ;;  %s2707_s30 = sld [smem:[#allocation26_spill]] }
  0x32   : > { %s2710_s24 = sld [smem:[#allocation8_spill]] }
  0x34   : > { %s2401_s28 = scalar_lea.vmem %s2704_s6, %s1875_s20  ;;  %s1878_s6 = sshll.u32 %s2378_s0, 5 }
  0x35   : > { %s2432_s21 = scalar_lea.vmem %s2648_s12, %s1878_s6 }
  0x36   : > { %s2418_s18 = scalar_lea.vmem %s2706_s10, %s1875_s20  ;;  %s2708_s10 = sld [smem:[#allocation27_spill]] }
  0x37   : > { %s838_s3 = scalar_lea.vmem %s2707_s30, %s2378_s0 }
  0x38   : > { %p1835_p0 = scmp.ne.s32.totalorder %s2710_s24, 0 }
  0x39   : > { %s2711_s24 = sld [smem:[#allocation20_spill]] (!%p1835_p0) }
  0x3a   : > { %846 = sbr.rel (%p1835_p0) target bundleno = 373 (0x175), region = 104  ;;  %s2712_s29 = sld [smem:[#allocation21_spill]] (!%p1835_p0) }
  0x3c   : > { %s841_s9 = scalar_lea.vmem %s2708_s10, %s2378_s0 }
  0x3f   : > { %v847_v0 = vld [vmem:[%s794_s26] sm:$0xff]  ;;  %vm850_vm0 = vcmask 261120  }
  0x40   : > { %v851_v1 = vsel %vm850_vm0, %v847_v0, 0.0  ;;  %v1836_v11 = vld [vmem:[%s2711_s24] ss:$0 sm:$0xff] }
  0x41   : > { %852 = vadd.xlane.f32.xlu0 %v851_v1  ;;  %v1837_v13 = vld [vmem:[%s2712_s29] ss:$0 sm:$0xff] }
  0xca   : > { %v853_v2 = vpop.xlane.xlu0 %852 }
  0xcb   : > { %v855_v3 = vmul.f32 0.03125, %v853_v2 }
  0xcd   : > { %v856_v4 = vsub.f32 %v847_v0, %v855_v3 }
  0xcf   : > { %v857_v5 = vmul.f32 %v856_v4, %v856_v4 }
  0xd1   : > { %v858_v6 = vsel %vm850_vm0, %v857_v5, 0.0 }
  0xd2   : > { %859 = vadd.xlane.f32.xlu0 %v858_v6 }
 0x15b   : > { %v860_v7 = vpop.xlane.xlu0 %859 }
 0x15c   : > { %v861_v8 = vmul.f32 0.03125, %v860_v7 }
 0x15e   : > { %v862_v9 = vadd.f32 1e-12, %v861_v8 }
 0x160   : > { %2062 = vrsqrt.f32 %v862_v9 }
 0x16d   : > { %v2063_v10 = vpop.eup %2062 }
 0x16e   : > { %v864_v12 = vmul.f32 %v2063_v10, %v856_v4 }
 0x170   : > { %v871_v14 = vmul.f32 %v1836_v11, %v864_v12 }
 0x172   : > { %v878_v15 = vadd.f32 %v1837_v13, %v871_v14 }
 0x174   : > { %879 = vst.msk [vmem:[#allocation2] sm:$0xff] %vm850_vm0, %v878_v15 }
 0x175 PF: > { %v2064_v16 = vld [vmem:[%s2392_s17 + $0x8] sm:$0xff]   ;;  %v2188_v17 = vmov 0.0   ;;  %v2065_v18 = vld [vmem:[%s2392_s17] sm:$0xff]   ;;  %vm2189_vm1 = vmmov 0   ;;  %vm905_vm2 = vcmask 261120   ;;  %s2713_s1 = scalar_lea.vmem %s2641_s5, %s2378_s0  ;;  %s2190_s4 = smov 112  }
 0x176   : > { %1907 = vmatprep.subr.bf16.mxu0 %v2188_v17  ;;  %1915 = vmatprep.subr.bf16.mxu1 %v2188_v17  ;;  %v1838_v21 = vld [vmem:[%s2713_s1] ss:$0 sm:$0xff]  ;;  %s2191_s2 = smov 96   ;;  %vm962_vm3 = vcmask 130048   ;;  %s2714_s16 = sld [smem:[#allocation19_spill]]  ;;  %vm1067_vm4 = vcmask 64512  }
 0x177   : > { %1908 = vmatpush3.bf16.msra.mxu0 %v2064_v16  ;;  %1911 = vmatprep.mubr.msk.bf16.mxu0 %vm2189_vm1, %v2188_v17  ;;  %s2192_s6 = smov 64   ;;  %vm1097_vm5 = vcmask 1043456   ;;  %v2066_v9 = vld [vmem:[%s2401_s28 + $0x8] sm:$0xff]   ;;  %v2067_v10 = vld [vmem:[%s2401_s28] sm:$0xff]   ;;  %s2716_s24 = scalar_lea.vmem %s2643_s7, %s2378_s0  ;;  %vm1402_vm6 = vcmask 523264  }
 0x178   : > { %1909 = vmatprep.subr.bf16.mxu0 %v2188_v17  ;;  %1917 = vmatprep.mubr.msk.bf16.mxu1 %vm2189_vm1, %v2188_v17  ;;  %s2717_s29 = scalar_lea.vmem %s2644_s8, %s2378_s0  ;;  %s2720_s19 = scalar_lea.vmem %s2647_s11, %s2378_s0 }
 0x179   : > { %s2723_s10 = sld [smem:[#allocation8_spill]] }
 0x17b   : > { %v2462_v19 = vld [vmem:[#allocation2] sm:$0xff]  ;;  %1910 = vmatpush3.bf16.msra.mxu0 %v2065_v18 }
 0x17c   : > { %v885_v20 = vpack.c.bf16 %v2462_v19, %v2462_v19  ;;  %1921 = vmatprep.subr.bf16.mxu0 %v2188_v17  ;;  %s2715_s14 = scalar_lea.vmem %s2714_s16, %s2375_s25  ;;  %s2193_s25 = smov 16  }
 0x17d   : > { %v1844_v38 = vld [vmem:[%s2715_s14] ss:$0 sm:$0xff] }
 0x17e   : > { %1912 = vmatmul.mubr.msk.bf16.vlgmr.msra.gmra.mxu0 %vm905_vm2, %v885_v20 }
 0x17f   : > { %1923 = vmatprep.mubr.msk.bf16.mxu0 %vm2189_vm1, %v2188_v17  ;;  %p1865_p1 = scmp.ne.s32.totalorder %s2723_s10, 1 }
 0x180   : > { %s2724_s30 = sld [smem:[#allocation28_spill]] (!%p1865_p1) }
 0x181   : > { %s2725_s17 = sld [smem:[#allocation30_spill]] (!%p1865_p1) }
 0x182   : > { %s2727_s20 = sld [smem:[#allocation31_spill]] (!%p1865_p1) }
 0x23e   : > { %v943_v22 = vpop.f32.mrf.mxu0 }
 0x23f   : > { %v944_v23 = vadd.f32 %v1838_v21, %v943_v22 }
 0x240   : > { %v1913_v24 = vpop.f32.mrf.mxu0 }
 0x241   : > { %950 = vrot.lane.b32.xlu0 %v944_v23, %s2190_s4  ;;  %v957_v25 = vpack.c.bf16 %v944_v23, %v944_v23  ;;  %v953_v32 = vmul.f32 0.25, %v944_v23 }
 0x242   : > { %v946_v26 = vpop.f32.mrf.mxu0 }
 0x243   : > { %960 = vrot.lane.b32.xlu1 %v957_v25, %s2191_s2  ;;  %v955_v33 = vpack.c.bf16 %v953_v32, %v953_v32 }
 0x244   : > { %v1914_v27 = vpop.f32.mrf.mxu0 }
 0x2b3   : > { %v951_v28 = vpop.permute.xlu0 %950 }
 0x2b4   : > { %v958_v29 = vpack.c.bf16 %v951_v28, %v951_v28  ;;  %v954_v36 = vmul.f32 0.25, %v951_v28 }
 0x2b5   : > { %v961_v30 = vpop.permute.xlu1 %960 }
 0x2b6   : > { %1010 = vrot.lane.b32.xlu0 %v958_v29, %s2191_s2  ;;  %v967_v31 = vsel %vm962_vm3, %v961_v30, 0  ;;  %v956_v37 = vpack.c.bf16 %v954_v36, %v954_v36  ;;  %s2726_s2 = sld [smem:[#allocation29_spill]] (!%p1865_p1) }
 0x2b7   : > { %1916 = vmatpush3.bf16.xpose.msra.mxu1 %v967_v31 }
 0x2b8   : > { %1927 = vmatprep.subr.bf16.mxu1 %v2188_v17 }
 0x2be   : > { %1918 = vmatmul.mubr.msk.bf16.vlgmr.msra.gmra.mxu1 %vm962_vm3, %v955_v33 }
 0x2bf   : > { %1929 = vmatprep.mubr.msk.bf16.mxu1 %vm2189_vm1, %v2188_v17 }
 0x328   : > { %v1011_v34 = vpop.permute.xlu0 %1010 }
 0x329   : > { %v1016_v35 = vsel %vm962_vm3, %v1011_v34, 0 }
 0x32a   : > { %1922 = vmatpush3.bf16.xpose.msra.mxu0 %v1016_v35 }
 0x32b   : > { %1933 = vmatprep.subr.bf16.mxu0 %v2188_v17 }
 0x331   : > { %1924 = vmatmul.mubr.msk.bf16.vlgmr.msra.gmra.mxu0 %vm962_vm3, %v956_v37  ;;  %v2068_v37 = vld [vmem:[%s2418_s18 + $0x8] sm:$0xff]  }
 0x332   : > { %1935 = vmatprep.mubr.msk.bf16.mxu0 %vm2189_vm1, %v2188_v17 }
 0x37e   : > { %v1003_v39 = vpop.f32.mrf.mxu1 }
 0x37f   : > { %v1065_v40 = vadd.f32 %v1844_v38, %v1003_v39 }
 0x380   : > { %v1919_v41 = vpop.f32.mrf.mxu1 }
 0x381   : > { %v1068_v42 = vsel %vm1067_vm4, %v1065_v40, -inf }
 0x382   : > { %1069 = vmax.xlane.f32.xlu0 %v1068_v42  ;;  %v1006_v43 = vpop.f32.mrf.mxu1  ;;  %v1851_v42 = vld [vmem:[%s2717_s29] ss:$0 sm:$0xff] }
 0x384   : > { %v1920_v44 = vpop.f32.mrf.mxu1 }
 0x3f1   : > { %v1052_v45 = vpop.f32.mrf.mxu0 }
 0x3f2   : > { %v1066_v46 = vadd.f32 %v1844_v38, %v1052_v45 }
 0x3f3   : > { %v1925_v47 = vpop.f32.mrf.mxu0 }
 0x3f4   : > { %v1071_v48 = vsel %vm1067_vm4, %v1066_v46, -inf }
 0x3f5   : > { %1072 = vmax.xlane.f32.xlu1 %v1071_v48  ;;  %v1055_v49 = vpop.f32.mrf.mxu0  ;;  %v2070_v48 = vld [vmem:[%s2432_s21 + $0x18] sm:$0xff]  }
 0x3f6   : > { %v2071_v49 = vld [vmem:[%s2432_s21 + $0x10] sm:$0xff]  }
 0x3f7   : > { %v1926_v50 = vpop.f32.mrf.mxu0 }
 0x3f8   : > { %v2072_v50 = vld [vmem:[%s2432_s21 + $0x8] sm:$0xff]  }
 0x406   : > { %1141 = vrot.lane.b32.xlu1 %v958_v29, %s2192_s6 }
 0x40b   : > { %v1070_v51 = vpop.xlane.xlu0 %1069 }
 0x40c   : > { %v1074_v52 = vsub.f32 %v1065_v40, %v1070_v51  ;;  %v2073_v51 = vld [vmem:[%s2432_s21] sm:$0xff]  }
 0x40e   : > { %v1076_v55 = vmul.f32 1.442695, %v1074_v52  ;;  %v1853_v52 = vld [vmem:[%s2720_s19] ss:$0 sm:$0xff] }
 0x47e   : > { %v1073_v53 = vpop.xlane.xlu1 %1072 }
 0x47f   : > { %v1075_v54 = vsub.f32 %v1066_v46, %v1073_v53 }
 0x481   : > { %v1078_v56 = vmul.f32 1.442695, %v1075_v54 }
 0x482   : > { %v1142_v57 = vpop.permute.xlu1 %1141 }
 0x483   : > { %2074 = vpow2.f32 %v1078_v56  ;;  %v1147_v58 = vsel %vm1097_vm5, %v1142_v57, 0 }
 0x484   : > { %1934 = vmatpush3.bf16.msra.mxu0 %v1147_v58  ;;  %2076 = vpow2.f32 %v1076_v55 }
 0x485   : > { %1947 = vmatprep.subr.bf16.mxu0 %v2188_v17 }
 0x490   : > { %v2075_v59 = vpop.eup %2074 }
 0x491   : > { %v1083_v60 = vsel %vm1067_vm4, %v2075_v59, 0.0  ;;  %v2077_v61 = vpop.eup %2076 }
 0x492   : > { %1084 = vadd.xlane.f32.xlu0 %v1083_v60  ;;  %v1080_v62 = vsel %vm1067_vm4, %v2077_v61, 0.0 }
 0x496   : > { %1081 = vadd.xlane.f32.xlu0 %v1080_v62 }
 0x4ac   : > { %1092 = vrot.lane.b32.xlu0 %v957_v25, %s2192_s6  ;;  %v1850_v25 = vld [vmem:[%s2716_s24] ss:$0 sm:$0xff] }
 0x51b   : > { %v1085_v63 = vpop.xlane.xlu0 %1084 }
 0x51c   : > { %2078 = vrcp.f32 %v1085_v63 }
 0x51f   : > { %v1082_v0 = vpop.xlane.xlu0 %1081 }
 0x520   : > { %2080 = vrcp.f32 %v1082_v0 }
 0x523   : > { %v1093_v1 = vpop.permute.xlu0 %1092 }
 0x524   : > { %v1099_v2 = vsel %vm1097_vm5, %v1093_v1, 0 }
 0x525   : > { %1928 = vmatpush3.bf16.msra.mxu1 %v1099_v2 }
 0x526   : > { %1939 = vmatprep.subr.bf16.mxu1 %v2188_v17 }
 0x529   : > { %v2079_v3 = vpop.eup %2078 }
 0x52a   : > { %v1089_v4 = vmul.f32 %v2079_v3, %v2075_v59 }
 0x52c   : > { %v1091_v5 = vpack.c.bf16 %v1089_v4, %v1089_v4  ;;  %v1862_v4 = vld [vmem:[%s835_s23] ss:$0 sm:$0xff] }
 0x52d   : > { %v2081_v6 = vpop.eup %2080 }
 0x52e   : > { %1936 = vmatmul.mubr.msk.bf16.vlgmr.msra.gmra.mxu0 %vm1067_vm4, %v1091_v5  ;;  %v1088_v7 = vmul.f32 %v2081_v6, %v2077_v61 }
 0x52f   : > { %1951 = vmatprep.mubr.msk.bf16.mxu0 %vm2189_vm1, %v2188_v17  ;;  %1948 = vmatpush3.bf16.msra.mxu0 %v2068_v37 }
 0x530   : > { %v1090_v8 = vpack.c.bf16 %v1088_v7, %v1088_v7  ;;  %1949 = vmatprep.subr.bf16.mxu0 %v2188_v17 }
 0x532   : > { %1930 = vmatmul.mubr.msk.bf16.vlgmr.msra.gmra.mxu1 %vm1067_vm4, %v1090_v8 }
 0x533   : > { %1943 = vmatprep.mubr.msk.bf16.mxu1 %vm2189_vm1, %v2188_v17  ;;  %1940 = vmatpush3.bf16.msra.mxu1 %v2066_v9 }
 0x534   : > { %1941 = vmatprep.subr.bf16.mxu1 %v2188_v17 }
 0x537   : > { %1942 = vmatpush3.bf16.msra.mxu1 %v2067_v10 }
 0x538   : > { %1955 = vmatprep.subr.bf16.mxu1 %v2188_v17 }
 0x5ee   : > { %v1183_v11 = vpop.f32.mrf.mxu0 }
 0x5ef   : > { %1190 = vrot.lane.b32.xlu1 %v1183_v11, %s2193_s25 }
 0x5f0   : > { %v1937_v12 = vpop.f32.mrf.mxu0 }
 0x5f2   : > { %v1135_v13 = vpop.f32.mrf.mxu1  ;;  %v1186_v14 = vpop.f32.mrf.mxu0 }
 0x5f4   : > { %v1931_v15 = vpop.f32.mrf.mxu1  ;;  %v1938_v16 = vpop.f32.mrf.mxu0 }
 0x5f6   : > { %v1138_v18 = vpop.f32.mrf.mxu1 }
 0x5f8   : > { %v1932_v20 = vpop.f32.mrf.mxu1 }
 0x661   : > { %v1191_v21 = vpop.permute.xlu1 %1190 }
 0x662   : > { %v1193_v22 = vsel %vm962_vm3, %v1135_v13, %v1191_v21 }
 0x663   : > { %v1198_v23 = vpack.c.bf16 %v1193_v22, %v1193_v22  ;;  %v1863_v22 = vld [vmem:[%s838_s3] ss:$0 sm:$0xff] }
 0x665   : > { %1944 = vmatmul.mubr.msk.bf16.vlgmr.msra.gmra.mxu1 %vm905_vm2, %v1198_v23 }
 0x666   : > { %1963 = vmatprep.mubr.msk.bf16.mxu1 %vm2189_vm1, %v2188_v17  ;;  %1956 = vmatpush3.bf16.msra.mxu1 %v2070_v48 }
 0x667   : > { %1957 = vmatprep.subr.bf16.mxu1 %v2188_v17 }
 0x66a   : > { %1958 = vmatpush3.bf16.msra.mxu1 %v2071_v49 }
 0x66b   : > { %1959 = vmatprep.subr.bf16.mxu1 %v2188_v17 }
 0x66e   : > { %1960 = vmatpush3.bf16.msra.mxu1 %v2072_v50 }
 0x66f   : > { %1961 = vmatprep.subr.bf16.mxu1 %v2188_v17 }
 0x672   : > { %1962 = vmatpush3.bf16.msra.mxu1 %v2073_v51 }
 0x725   : > { %v1248_v24 = vpop.f32.mrf.mxu1 }
 0x726   : > { %v1254_v26 = vadd.f32 %v1248_v24, %v2462_v19  ;;  %v2069_v19 = vld [vmem:[%s2418_s18] sm:$0xff]   ;;  %s2718_s18 = sld [smem:[#allocation24_spill]] }
 0x727   : > { %v1945_v27 = vpop.f32.mrf.mxu1  ;;  %1950 = vmatpush3.bf16.msra.mxu0 %v2069_v19  ;;  %v1864_v24 = vld [vmem:[%s841_s9] ss:$0 sm:$0xff] }
 0x728   : > { %v1262_v28 = vadd.f32 %v1850_v25, %v1254_v26 }
 0x729   : > { %v1251_v29 = vpop.f32.mrf.mxu1 }
 0x72a   : > { %v1265_v30 = vsel %vm905_vm2, %v1262_v28, 0.0 }
 0x72b   : > { %1266 = vadd.xlane.f32.xlu1 %v1265_v30  ;;  %v1946_v31 = vpop.f32.mrf.mxu1 }
 0x72c   : > { %s2719_s1 = scalar_lea.vmem %s2718_s18, %s2378_s0 }
 0x72d   : > { %v1852_v44 = vld [vmem:[%s2719_s1] ss:$0 sm:$0xff] }
 0x7b4   : > { %v1267_v32 = vpop.xlane.xlu1 %1266 }
 0x7b5   : > { %v1269_v33 = vmul.f32 0.03125, %v1267_v32 }
 0x7b7   : > { %v1270_v34 = vsub.f32 %v1262_v28, %v1269_v33 }
 0x7b9   : > { %v1271_v35 = vmul.f32 %v1270_v34, %v1270_v34 }
 0x7bb   : > { %v1272_v36 = vsel %vm905_vm2, %v1271_v35, 0.0 }
 0x7bc   : > { %1273 = vadd.xlane.f32.xlu0 %v1272_v36 }
 0x845   : > { %v1274_v38 = vpop.xlane.xlu0 %1273 }
 0x846   : > { %v1275_v39 = vmul.f32 0.03125, %v1274_v38 }
 0x848   : > { %v1276_v40 = vadd.f32 1e-12, %v1275_v39 }
 0x84a   : > { %2082 = vrsqrt.f32 %v1276_v40 }
 0x857   : > { %v2083_v41 = vpop.eup %2082 }
 0x858   : > { %v1278_v43 = vmul.f32 %v2083_v41, %v1270_v34 }
 0x85a   : > { %v1285_v45 = vmul.f32 %v1851_v42, %v1278_v43 }
 0x85c   : > { %v1292_v46 = vadd.f32 %v1852_v44, %v1285_v45 }
 0x85e   : > { %v1297_v47 = vpack.c.bf16 %v1292_v46, %v1292_v46 }
 0x860   : > { %1952 = vmatmul.mubr.msk.bf16.vlgmr.msra.gmra.mxu0 %vm905_vm2, %v1297_v47 }
 0x920   : > { %v1354_v53 = vpop.f32.mrf.mxu0 }
 0x921   : > { %v1355_v54 = vadd.f32 %v1853_v52, %v1354_v53 }
 0x922   : > { %v1953_v55 = vpop.f32.mrf.mxu0 }
 0x923   : > { %v1361_v56 = vmul.f32 0.044715, %v1355_v54  ;;  %v1360_v17 = vmul.f32 0.5, %v1355_v54 }
 0x924   : > { %v1357_v57 = vpop.f32.mrf.mxu0 }
 0x925   : > { %v1362_v58 = vmul.f32 %v1361_v56, %v1355_v54 }
 0x926   : > { %v1954_v59 = vpop.f32.mrf.mxu0 }
 0x927   : > { %v1363_v60 = vmul.f32 %v1362_v58, %v1355_v54 }
 0x929   : > { %v1364_v61 = vadd.f32 %v1363_v60, %v1355_v54 }
 0x92b   : > { %v1365_v62 = vmul.f32 0.7978846, %v1364_v61 }
 0x92d   : > { %2084 = vtanh.f32 %v1365_v62 }
 0x93a   : > { %v2085_v63 = vpop.eup %2084 }
 0x93b   : > { %v1367_v0 = vadd.f32 1.0, %v2085_v63 }
 0x93d   : > { %v1368_v1 = vmul.f32 %v1367_v0, %v1360_v17 }
 0x93f   : > { %v1377_v2 = vpack.c.bf16 %v1368_v1, %v1368_v1 }
 0x941   : > { %1964 = vmatmul.mubr.msk.bf16.vlgmr.msra.gmra.mxu1 %vm1402_vm6, %v1377_v2 }
 0xa01   : > { %v1440_v3 = vpop.f32.mrf.mxu1 }
 0xa02   : > { %v1446_v5 = vadd.f32 %v1440_v3, %v1292_v46 }
 0xa03   : > { %v1965_v6 = vpop.f32.mrf.mxu1 }
 0xa04   : > { %v1454_v7 = vadd.f32 %v1862_v4, %v1446_v5 }
 0xa05   : > { %v1443_v8 = vpop.f32.mrf.mxu1 }
 0xa06   : > { %v1457_v9 = vsel %vm905_vm2, %v1454_v7, 0.0 }
 0xa07   : > { %1458 = vadd.xlane.f32.xlu1 %v1457_v9  ;;  %v1966_v10 = vpop.f32.mrf.mxu1 }
 0xa90   : > { %v1459_v11 = vpop.xlane.xlu1 %1458 }
 0xa91   : > { %v1460_v12 = vmul.f32 0.03125, %v1459_v11 }
 0xa93   : > { %v1461_v13 = vsub.f32 %v1454_v7, %v1460_v12 }
 0xa95   : > { %v1462_v14 = vmul.f32 %v1461_v13, %v1461_v13 }
 0xa97   : > { %v1463_v15 = vsel %vm905_vm2, %v1462_v14, 0.0 }
 0xa98   : > { %1464 = vadd.xlane.f32.xlu0 %v1463_v15 }
 0xb21   : > { %v1465_v16 = vpop.xlane.xlu0 %1464 }
 0xb22   : > { %v1466_v18 = vmul.f32 0.03125, %v1465_v16 }
 0xb24   : > { %v1467_v20 = vadd.f32 1e-12, %v1466_v18 }
 0xb26   : > { %2086 = vrsqrt.f32 %v1467_v20 }
 0xb33   : > { %v2087_v21 = vpop.eup %2086 }
 0xb34   : > { %v1469_v23 = vmul.f32 %v2087_v21, %v1461_v13 }
 0xb36   : > { %v1476_v25 = vmul.f32 %v1863_v22, %v1469_v23  ;;  %1488 = sbr.rel (%p1865_p1) target bundleno = 3294 (0xcde), region = 108 }
 0xb38   : > { %v1483_v26 = vadd.f32 %v1864_v24, %v1476_v25 }
 0xb3a   : > { %1484 = vst.msk [vmem:[#allocation2] sm:$0xff] %vm905_vm2, %v1483_v26 }
 0xb3b   : > { %v2088_v27 = vld [vmem:[%s2724_s30 + $0x8] sm:$0xff]   ;;  %v2194_v28 = vmov 0.0   ;;  %v2089_v29 = vld [vmem:[%s2724_s30] sm:$0xff]   ;;  %vm2195_vm7 = vmmov 0   ;;  %v1493_v30 = vpack.c.bf16 %v1483_v26, %v1483_v26 }
 0xb3c   : > { %1967 = vmatprep.subr.bf16.mxu0 %v2194_v28  ;;  %1975 = vmatprep.subr.bf16.mxu1 %v2194_v28  ;;  %v2090_v31 = vld [vmem:[%s2725_s17 + $0x8] sm:$0xff]   ;;  %v2091_v32 = vld [vmem:[%s2725_s17] sm:$0xff]  }
 0xb3d   : > { %1968 = vmatpush3.bf16.msra.mxu0 %v2088_v27  ;;  %1971 = vmatprep.mubr.msk.bf16.mxu0 %vm2195_vm7, %v2194_v28  ;;  %v1494_v33 = vld [vmem:[%s2726_s2] sm:$0x1] }
 0xb3e   : > { %1969 = vmatprep.subr.bf16.mxu0 %v2194_v28  ;;  %1979 = vmatprep.mubr.msk.bf16.mxu1 %vm2195_vm7, %v2194_v28  ;;  %v1556_v40 = vld [vmem:[%s2727_s20] sm:$0x1] }
 0xb3f   : > { %1976 = vmatpush3.bf16.msra.mxu1 %v2090_v31 }
 0xb40   : > { %1977 = vmatprep.subr.bf16.mxu1 %v2194_v28 }
 0xb41   : > { %1970 = vmatpush3.bf16.msra.mxu0 %v2089_v29 }
 0xb43   : > { %1978 = vmatpush3.bf16.msra.mxu1 %v2091_v32 }
 0xb44   : > { %1972 = vmatmul.mubr.msk.bf16.vlgmr.msra.gmra.mxu0 %vm905_vm2, %v1493_v30 }
 0xc04   : > { %v1544_v34 = vpop.f32.mrf.mxu0 }
 0xc05   : > { %v1545_v35 = vadd.f32 %v1544_v34, %v1494_v33 }
 0xc06   : > { %v1973_v36 = vpop.f32.mrf.mxu0 }
 0xc07   : > { %2092 = vtanh.f32 %v1545_v35 }
 0xc08   : > { %v1547_v37 = vpop.f32.mrf.mxu0 }
 0xc0a   : > { %v1974_v19 = vpop.f32.mrf.mxu0 }
 0xc14   : > { %v2093_v38 = vpop.eup %2092 }
 0xc15   : > { %v1555_v39 = vpack.c.bf16 %v2093_v38, %v2093_v38 }
 0xc17   : > { %1980 = vmatmul.mubr.msk.bf16.vlgmr.msra.gmra.mxu1 %vm905_vm2, %v1555_v39 }
 0xcd7   : > { %v1606_v41 = vpop.f32.mrf.mxu1 }
 0xcd8   : > { %v1607_v42 = vadd.f32 %v1606_v41, %v1556_v40 }
 0xcd9   : > { %v1981_v43 = vpop.f32.mrf.mxu1 }
 0xcda   : > { %1612 = vst [vmem:[%s2444_s15] sm:$0x1] %v1607_v42 }
 0xcdb   : > { %v1609_v44 = vpop.f32.mrf.mxu1 }
 0xcdd   : > { %v1982_v45 = vpop.f32.mrf.mxu1 }
 0xcde PF: > { %s2728_s23 = sld [smem:[#allocation9_spill]]  ;;  %s1626_s24 = sshll.u32 %s2444_s15, 4  ;;  %s1627_s24 = int_to_ptr.vmem [resolvable:$true] %s1626_s24 }
 0xcdf   : > { %s2730_s28 = sld [smem:[#allocation32_spill]]  ;;  %s2731_s26 = sand.u32 1, %s2162_s22  }
 0xce0   : > { %s1614_s3 = scalar_lea.sflag [#allocation4], %s2731_s26  ;;  %s2094_s29 = scalar_lea.vmem %s1627_s24, 16 }
 0xce1   : > { %p2095_p2 = scmp.ne.s32.totalorder %s1627_s24, %s2094_s29  ;;  %s2196_s9 = smov [#allocation3]  }
 0xce2   : > { %s2098_s0 = sshll.u32 %s2196_s9, 4  ;;  %s2099_s0 = int_to_ptr.vmem [resolvable:$false] %s2098_s0 }
 0xce3   : > { %p2096_p4 = pnand %p2095_p2, %p2351_p3  ;;  %s2100_s27 = scalar_lea.vmem %s2099_s0, 32 }
 0xce4   : > { %s1872_s14 = sshll.u32 %s2728_s23, 4  ;;  %p2101_p6 = scmp.lt.s32.totalorder %s1627_s24, %s2099_s0 }
 0xce5   : > { %s1624_s10 = scalar_lea.hbm %s2730_s28, %s1872_s14  ;;  %p2097_p5 = pneg %p2096_p4 }
 0xce6   : > { %p2102_p7 = scmp.lt.s32.totalorder %s2100_s27, %s2094_s29 }
 0xce8   : > { %p2103_p8 = por %p2102_p7, %p2101_p6 }
 0xcea   : > { %p2104_p10 = pnand %p2103_p8, %p2097_p5 }
 0xcec   : > { %2107 = shalt.err (!%p2104_p10)
}
 0xced   : > { %s2108_s18 = scalar_lea.hbm %s1624_s10, 16  ;;  %s2112_s4 = scalar_lea.hbm %s2730_s28, 32 }
 0xcee   : > { %p2109_p11 = scmp.ne.s32.totalorder %s1624_s10, %s2108_s18  ;;  %p2113_p0 = scmp.lt.s32.totalorder %s1624_s10, %s2730_s28 }
 0xcef   : > { %p2114_p1 = scmp.lt.s32.totalorder %s2112_s4, %s2108_s18 }
 0xcf0   : > { %p2110_p12 = pnand %p2109_p11, %p2351_p3 }
 0xcf1   : > { %p2115_p2 = por %p2114_p1, %p2113_p0 }
 0xcf2   : > { %p2111_p13 = pneg %p2110_p12 }
 0xcf4   : > { %p2116_p4 = pnand %p2115_p2, %p2111_p13 }
 0xcf6   : > { %2119 = shalt.err (!%p2116_p4)
}
 0xcf7   : > { %1983 = dma.vmem_to_hbm [thread:$0]  (%p2351_p3), %s1627_s24, 16, %s1624_s10, %s1614_s3  }
 0xcf8 PF: > { %s2732_s21 = sld [smem:[#allocation12_spill]] }
 0xcf9   : > { %s2733_s20 = sld [smem:[#allocation6_spill]] }
 0xcfe   : > { %p1989_p5 = scmp.ge.s32.totalorder %s2732_s21, 2 }
 0xcff   : > { %s1638_s14 = sand.u32 1, %s2733_s20  }
 0xd00   : > { %p1986_p6 = pnand %p1989_p5, %p2361_p9  ;;  %s1639_s6 = scalar_lea.sflag [#allocation4], %s1638_s14 }
 0xd02   : > { %p1987_p7 = pneg %p1986_p6 }
 0xd04   : > { %2153 = dma.done.wait (%p1987_p7), %s1639_s6, 16  }
 0xd05   : > { %2155 = vsyncadd (%p1987_p7), %s1639_s6, 4294967280  ;;  %s33_s26 = sadd.s32 1, %s2732_s21   ;;  %s2735_s25 = sld [smem:[#allocation7_spill]] }
 0xd06   : > { %p30_p8 = scmp.ge.s32.totalorder %s33_s26, 6   ;;  %s2736_s23 = sld [smem:[#allocation17_spill]] }
 0xd07   : > { %s2737_s24 = sld [smem:[#allocation10_spill]]  ;;  %s2741_s1 = smov %s2162_s22 }
 0xd08   : > { %s2738_s2 = sld [smem:[#allocation11_spill]] }
 0xd09   : > { %s2739_s16 = sld [smem:[#allocation13_spill]] }
 0xd0a   : > { %s2740_s3 = sld [smem:[#allocation15_spill]] }
 0xd0b   : > { %s2742_s22 = smov %s2735_s25  ;;  %32 = sbr.rel (!%p30_p8) target bundleno = 21 (0x15), region = 182 }
 0xd0f   : > { %s2743_s25 = smov %s2739_s16 }
 0xd10   :  { %1643 = vsyncpa [#allocation4], 1 }
 0xd11   :  { %1645 = vsyncpa [#allocation4 + $0x1], 1 }

</bundles_post_ra>
